<compile_context>
chip_gen: v7x
topology: tpu7x:2x2x1
jax: 0.10.0
libtpu: 0.0.40
codegen_flags: <defaults>
</compile_context>

<pallas_src>
import math

import jax
import jax.numpy as jnp
from jax.experimental import pallas as pl
from jax.experimental.pallas import tpu as pltpu


# --------------------------------------------------------------------------
# Kernel
# --------------------------------------------------------------------------
def _qnetwork_kernel(
    s_ref,    # (TILE_B, num_inputs)   f32 or bf16
    a_ref,    # (TILE_B, num_actions)  f32 or bf16
    w1s_ref,  # (num_inputs, 2H)   fused W1||W4, state rows
    w1a_ref,  # (num_actions, 2H)  fused W1||W4, action rows
    b1_ref,   # (1, 2H)  f32
    w2_ref,   # (2H, 2H) block-diag(W2, W5)
    b2_ref,   # (1, 2H)  f32
    w3_ref,   # (2H, 2)  block-diag(W3, W6)
    b3_ref,   # (1, 2)   f32
    q_ref,    # (TILE_B, 2)  -> [q1 | q2]
):
    # layer 1: xu @ W1f  ==  state @ W1f[:ni] + action @ W1f[ni:]   (f32 acc)
    h = jnp.dot(s_ref[...], w1s_ref[...], preferred_element_type=jnp.float32)
    h = h + jnp.dot(a_ref[...], w1a_ref[...], preferred_element_type=jnp.float32)
    h = jnp.maximum(h + b1_ref[...], 0.0)                      # f32 elementwise

    # layer 2 (block-diagonal keeps the two heads independent)
    h = jnp.dot(h.astype(w2_ref.dtype), w2_ref[...],
                preferred_element_type=jnp.float32) + b2_ref[...]
    h = jnp.maximum(h, 0.0)

    # layer 3 -> (TILE_B, 2) = [q1 | q2]
    q = jnp.dot(h.astype(w3_ref.dtype), w3_ref[...],
                preferred_element_type=jnp.float32) + b3_ref[...]
    q_ref[...] = q.astype(q_ref.dtype)


# --------------------------------------------------------------------------
# Wrapper
# --------------------------------------------------------------------------
def _round_up(x, m):
    return ((x + m - 1) // m) * m


def _pick_tile(batch, max_tile_b=1024, min_grid=2):
    """Large batch tile (step-overhead bound kernel), but keep >=2 grid steps
    when the batch allows it so v7x's two TensorCores both get work."""
    b8 = _round_up(batch, 8)
    tile_b = min(max_tile_b, b8)
    if b8 >= 2 * 8 and pl.cdiv(batch, tile_b) < min_grid:
        tile_b = max(8, _round_up(pl.cdiv(b8, min_grid), 8))
    return tile_b


def qnetwork_forward_fused(state, action, packed_params, *, max_tile_b=1024):
    """Fused forward: returns q of shape (B, 2) = [q1 | q2]."""
    (w1s, w1a, b1f, w2f, b2f, w3f, b3f) = packed_params

    B, num_inputs = state.shape
    num_actions = action.shape[1]

    # Match input dtype to the (possibly bf16) packed weights.
    cdt = w1s.dtype
    state = state.astype(cdt)
    action = action.astype(cdt)

    tile_b = _pick_tile(B, max_tile_b)
    grid = (pl.cdiv(B, tile_b),)   # partial last block is padded/masked by Pallas

    const2d = lambda shape: pl.BlockSpec(shape, lambda i: (0, 0))

    in_specs = [
        pl.BlockSpec((tile_b, num_inputs), lambda i: (i, 0)),   # state
        pl.BlockSpec((tile_b, num_actions), lambda i: (i, 0)),  # action
        const2d(w1s.shape), const2d(w1a.shape), const2d(b1f.shape),
        const2d(w2f.shape), const2d(b2f.shape),
        const2d(w3f.shape), const2d(b3f.shape),
    ]
    out_specs = pl.BlockSpec((tile_b, 2), lambda i: (i, 0))
    out_shape = jax.ShapeDtypeStruct((B, 2), jnp.float32)

    q = pl.pallas_call(
        _qnetwork_kernel,
        grid=grid,
        in_specs=in_specs,
        out_specs=out_specs,
        out_shape=out_shape,
        compiler_params=pltpu.CompilerParams(
            dimension_semantics=("parallel",),
            # Cheap insurance; well above what tile_b<=1024 actually needs,
            # and below every generation's physical VMEM.
            vmem_limit_bytes=32 * 1024 * 1024,
        ),
    )(state, action, w1s, w1a, b1f, w2f, b2f, w3f, b3f)

    return q


def qnetwork_forward(state, action, packed_params, *, max_tile_b=1024):
    """PyTorch-API-compatible forward: returns (q1, q2), each (B, 1).

    Prefer qnetwork_forward_fused where the consumer can take the (B, 2) pair
    (e.g. SAC's min(q1, q2) is a row-wise min over it)."""
    q = qnetwork_forward_fused(state, action, packed_params, max_tile_b=max_tile_b)
    return q[:, 0:1], q[:, 1:2]


# --------------------------------------------------------------------------
# Parameter init (matches PyTorch xavier_uniform_ / constant_(0)) + packing
# --------------------------------------------------------------------------
def _xavier_uniform(key, fan_in, fan_out, dtype=jnp.float32):
    bound = math.sqrt(6.0 / (fan_in + fan_out))
    return jax.random.uniform(key, (fan_in, fan_out), dtype, minval=-bound, maxval=bound)


def init_qnetwork_params(key, num_inputs, num_actions, hidden_dim):
    """Unfused params (w_i stored as (in, out)); mirrors the PyTorch module."""
    D = num_inputs + num_actions
    ks = jax.random.split(key, 6)
    w1 = _xavier_uniform(ks[0], D, hidden_dim)
    w2 = _xavier_uniform(ks[1], hidden_dim, hidden_dim)
    w3 = _xavier_uniform(ks[2], hidden_dim, 1)
    w4 = _xavier_uniform(ks[3], D, hidden_dim)
    w5 = _xavier_uniform(ks[4], hidden_dim, hidden_dim)
    w6 = _xavier_uniform(ks[5], hidden_dim, 1)
    zeros = lambda n: jnp.zeros((1, n), jnp.float32)
    return (w1, zeros(hidden_dim), w2, zeros(hidden_dim), w3, zeros(1),
            w4, zeros(hidden_dim), w5, zeros(hidden_dim), w6, zeros(1))


def pack_qnetwork_params(params, num_inputs, compute_dtype=jnp.float32):
    """One-time fusion of the twin heads into lane-denser fused weights.

    compute_dtype=jnp.bfloat16 enables the bf16 MXU path (weights + activations
    in bf16, f32 accumulation; biases stay f32)."""
    (w1, b1, w2, b2, w3, b3, w4, b4, w5, b5, w6, b6) = params
    H = w1.shape[1]

    w1f = jnp.concatenate([w1, w4], axis=1)        # (D, 2H)
    w1s = w1f[:num_inputs]                         # (num_inputs, 2H)
    w1a = w1f[num_inputs:]                         # (num_actions, 2H)
    b1f = jnp.concatenate([b1, b4], axis=1)        # (1, 2H)

    zH = jnp.zeros((H, H), w2.dtype)
    w2f = jnp.block([[w2, zH], [zH, w5]])          # (2H, 2H) block-diag
    b2f = jnp.concatenate([b2, b5], axis=1)        # (1, 2H)

    z1 = jnp.zeros((H, 1), w3.dtype)
    w3f = jnp.block([[w3, z1], [z1, w6]])          # (2H, 2) block-diag
    b3f = jnp.concatenate([b3, b6], axis=1)        # (1, 2)

    cdt = compute_dtype
    return (w1s.astype(cdt), w1a.astype(cdt), b1f.astype(jnp.float32),
            w2f.astype(cdt), b2f.astype(jnp.float32),
            w3f.astype(cdt), b3f.astype(jnp.float32))


# --------------------------------------------------------------------------
# Pure-JAX reference (mirrors the PyTorch forward exactly)
# --------------------------------------------------------------------------
def qnetwork_reference(state, action, params):
    (w1, b1, w2, b2, w3, b3, w4, b4, w5, b5, w6, b6) = params
    xu = jnp.concatenate([state, action], axis=1)
    x1 = jax.nn.relu(xu @ w1 + b1)
    x1 = jax.nn.relu(x1 @ w2 + b2)
    x1 = x1 @ w3 + b3
    x2 = jax.nn.relu(xu @ w4 + b4)
    x2 = jax.nn.relu(x2 @ w5 + b5)
    x2 = x2 @ w6 + b6
    return x1, x2


# --------------------------------------------------------------------------
if __name__ == "__main__":
    num_inputs, num_actions, hidden_dim = 16, 8, 32
    batch = 8

    key = jax.random.PRNGKey(0)
    k_state, k_action, k_params = jax.random.split(key, 3)

    state = jax.random.normal(k_state, (batch, num_inputs), jnp.float32)
    action = jax.random.normal(k_action, (batch, num_actions), jnp.float32)
    params = init_qnetwork_params(k_params, num_inputs, num_actions, hidden_dim)

    # ---- f32 path: exact parity with the PyTorch-equivalent reference ----
    packed_f32 = pack_qnetwork_params(params, num_inputs, jnp.float32)

    q1, q2 = qnetwork_forward(state, action, packed_f32)
    jax.block_until_ready((q1, q2))
    q1_ref, q2_ref = qnetwork_reference(state, action, params)
    assert q1.shape == (batch, 1) and q2.shape == (batch, 1)
    assert jnp.allclose(q1, q1_ref, atol=1e-5, rtol=1e-5)
    assert jnp.allclose(q2, q2_ref, atol=1e-5, rtol=1e-5)

    # Partial-last-block path (B not a multiple of 8, no host-side padding).
    s5, a5 = state[:5], action[:5]
    p1, p2 = qnetwork_forward(s5, a5, packed_f32)
    jax.block_until_ready((p1, p2))
    r1, r2 = qnetwork_reference(s5, a5, params)
    assert p1.shape == (5, 1) and p2.shape == (5, 1)
    assert jnp.allclose(p1, r1, atol=1e-5, rtol=1e-5)
    assert jnp.allclose(p2, r2, atol=1e-5, rtol=1e-5)

    # Multi-step grid (>=2 steps for v7x TC sharding) + partial last block.
    bm = 40
    km1, km2 = jax.random.split(jax.random.PRNGKey(1))
    sm = jax.random.normal(km1, (bm, num_inputs), jnp.float32)
    am = jax.random.normal(km2, (bm, num_actions), jnp.float32)
    m1, m2 = qnetwork_forward(sm, am, packed_f32)
    jax.block_until_ready((m1, m2))
    mr1, mr2 = qnetwork_reference(sm, am, params)
    assert m1.shape == (bm, 1) and m2.shape == (bm, 1)
    assert jnp.allclose(m1, mr1, atol=1e-5, rtol=1e-5)
    assert jnp.allclose(m2, mr2, atol=1e-5, rtol=1e-5)

    # ---- bf16 path: halves input DMA bytes / MXU passes; looser tolerance ----
    packed_bf16 = pack_qnetwork_params(params, num_inputs, jnp.bfloat16)
    h1, h2 = qnetwork_forward(state, action, packed_bf16)
    jax.block_until_ready((h1, h2))
    assert h1.shape == (batch, 1) and h2.shape == (batch, 1)
    assert jnp.allclose(h1, q1_ref, atol=5e-2, rtol=5e-2)
    assert jnp.allclose(h2, q2_ref, atol=5e-2, rtol=5e-2)

    print("KERNEL_OK")
</pallas_src>

<mosaic_0001>
module attributes {stable_mosaic.version = 11 : i64} {
  func.func @_qnetwork_kernel(%arg0: i32, %arg1: memref<8x16xf32, #tpu.memory_space<vmem>>, %arg2: memref<8x8xf32, #tpu.memory_space<vmem>>, %arg3: memref<16x64xf32, #tpu.memory_space<vmem>>, %arg4: memref<8x64xf32, #tpu.memory_space<vmem>>, %arg5: memref<1x64xf32, #tpu.memory_space<vmem>>, %arg6: memref<64x64xf32, #tpu.memory_space<vmem>>, %arg7: memref<1x64xf32, #tpu.memory_space<vmem>>, %arg8: memref<64x2xf32, #tpu.memory_space<vmem>>, %arg9: memref<1x2xf32, #tpu.memory_space<vmem>>, %arg10: memref<8x2xf32, #tpu.memory_space<vmem>>) attributes {dimension_semantics = [#tpu.dimension_semantics<parallel>], iteration_bounds = array<i64: 1>, scalar_prefetch = 0 : i64, scratch_operands = 0 : i64, tpu.core_type = #tpu.core_type<tc>, window_params = [{transform_indices = @transform_0, window_bounds = array<i64: 8, 16>}, {transform_indices = @transform_1, window_bounds = array<i64: 8, 8>}, {pipeline_mode = #tpu.pipeline_mode<synchronous>, transform_indices = @transform_2, window_bounds = array<i64: 16, 64>}, {pipeline_mode = #tpu.pipeline_mode<synchronous>, transform_indices = @transform_3, window_bounds = array<i64: 8, 64>}, {pipeline_mode = #tpu.pipeline_mode<synchronous>, transform_indices = @transform_4, window_bounds = array<i64: 1, 64>}, {pipeline_mode = #tpu.pipeline_mode<synchronous>, transform_indices = @transform_5, window_bounds = array<i64: 64, 64>}, {pipeline_mode = #tpu.pipeline_mode<synchronous>, transform_indices = @transform_6, window_bounds = array<i64: 1, 64>}, {pipeline_mode = #tpu.pipeline_mode<synchronous>, transform_indices = @transform_7, window_bounds = array<i64: 64, 2>}, {pipeline_mode = #tpu.pipeline_mode<synchronous>, transform_indices = @transform_8, window_bounds = array<i64: 1, 2>}, {transform_indices = @transform_9, window_bounds = array<i64: 8, 2>}]} {
    %c0 = arith.constant 0 : index
    %c0_0 = arith.constant 0 : index
    %0 = vector.load %arg1[%c0, %c0_0] : memref<8x16xf32, #tpu.memory_space<vmem>>, vector<8x16xf32>
    %c0_1 = arith.constant 0 : index
    %c0_2 = arith.constant 0 : index
    %1 = vector.load %arg3[%c0_1, %c0_2] : memref<16x64xf32, #tpu.memory_space<vmem>>, vector<16x64xf32>
    %cst = arith.constant dense<0.000000e+00> : vector<8x64xf32>
    %2 = tpu.matmul %0, %1, %cst {dimension_numbers = #tpu.dot_dimension_numbers<[1], [0], [0], [1], [0, 0, 1, 1], [], []>} : vector<8x16xf32>, vector<16x64xf32>, vector<8x64xf32> -> vector<8x64xf32>
    %c0_3 = arith.constant 0 : index
    %c0_4 = arith.constant 0 : index
    %3 = vector.load %arg2[%c0_3, %c0_4] : memref<8x8xf32, #tpu.memory_space<vmem>>, vector<8x8xf32>
    %c0_5 = arith.constant 0 : index
    %c0_6 = arith.constant 0 : index
    %4 = vector.load %arg4[%c0_5, %c0_6] : memref<8x64xf32, #tpu.memory_space<vmem>>, vector<8x64xf32>
    %cst_7 = arith.constant dense<0.000000e+00> : vector<8x64xf32>
    %5 = tpu.matmul %3, %4, %cst_7 {dimension_numbers = #tpu.dot_dimension_numbers<[1], [0], [0], [1], [0, 0, 1, 1], [], []>} : vector<8x8xf32>, vector<8x64xf32>, vector<8x64xf32> -> vector<8x64xf32>
    %6 = arith.addf %2, %5 : vector<8x64xf32>
    %c0_8 = arith.constant 0 : index
    %c0_9 = arith.constant 0 : index
    %7 = vector.load %arg5[%c0_8, %c0_9] : memref<1x64xf32, #tpu.memory_space<vmem>>, vector<1x64xf32>
    %8 = vector.broadcast %7 : vector<1x64xf32> to vector<8x64xf32>
    %9 = arith.addf %6, %8 : vector<8x64xf32>
    %cst_10 = arith.constant 0.000000e+00 : f32
    %10 = vector.broadcast %cst_10 : f32 to vector<8x64xf32>
    %11 = arith.maximumf %9, %10 : vector<8x64xf32>
    %c0_11 = arith.constant 0 : index
    %c0_12 = arith.constant 0 : index
    %12 = vector.load %arg6[%c0_11, %c0_12] : memref<64x64xf32, #tpu.memory_space<vmem>>, vector<64x64xf32>
    %cst_13 = arith.constant dense<0.000000e+00> : vector<8x64xf32>
    %13 = tpu.matmul %11, %12, %cst_13 {dimension_numbers = #tpu.dot_dimension_numbers<[1], [0], [0], [1], [0, 0, 1, 1], [], []>} : vector<8x64xf32>, vector<64x64xf32>, vector<8x64xf32> -> vector<8x64xf32>
    %c0_14 = arith.constant 0 : index
    %c0_15 = arith.constant 0 : index
    %14 = vector.load %arg7[%c0_14, %c0_15] : memref<1x64xf32, #tpu.memory_space<vmem>>, vector<1x64xf32>
    %15 = vector.broadcast %14 : vector<1x64xf32> to vector<8x64xf32>
    %16 = arith.addf %13, %15 : vector<8x64xf32>
    %cst_16 = arith.constant 0.000000e+00 : f32
    %17 = vector.broadcast %cst_16 : f32 to vector<8x64xf32>
    %18 = arith.maximumf %16, %17 : vector<8x64xf32>
    %c0_17 = arith.constant 0 : index
    %c0_18 = arith.constant 0 : index
    %19 = vector.load %arg8[%c0_17, %c0_18] : memref<64x2xf32, #tpu.memory_space<vmem>>, vector<64x2xf32>
    %cst_19 = arith.constant dense<0.000000e+00> : vector<8x2xf32>
    %20 = tpu.matmul %18, %19, %cst_19 {dimension_numbers = #tpu.dot_dimension_numbers<[1], [0], [0], [1], [0, 0, 1, 1], [], []>} : vector<8x64xf32>, vector<64x2xf32>, vector<8x2xf32> -> vector<8x2xf32>
    %c0_20 = arith.constant 0 : index
    %c0_21 = arith.constant 0 : index
    %21 = vector.load %arg9[%c0_20, %c0_21] : memref<1x2xf32, #tpu.memory_space<vmem>>, vector<1x2xf32>
    %22 = vector.broadcast %21 : vector<1x2xf32> to vector<8x2xf32>
    %23 = arith.addf %20, %22 : vector<8x2xf32>
    %c0_22 = arith.constant 0 : index
    %c0_23 = arith.constant 0 : index
    %24 = vector.load %arg10[%c0_22, %c0_23] : memref<8x2xf32, #tpu.memory_space<vmem>>, vector<8x2xf32>
    tpu.vector_store %arg10[%c0_22, %c0_23], %23 {strides = array<i32>} : memref<8x2xf32, #tpu.memory_space<vmem>>, vector<8x2xf32>,
    return
  }
  func.func @transform_0(%arg0: i32) -> (i32, i32) {
    %c0_i32 = arith.constant 0 : i32
    %c0_i32_0 = arith.constant 0 : i32
    return %arg0, %c0_i32 : i32, i32
  }
  func.func @transform_1(%arg0: i32) -> (i32, i32) {
    %c0_i32 = arith.constant 0 : i32
    %c0_i32_0 = arith.constant 0 : i32
    return %arg0, %c0_i32 : i32, i32
  }
  func.func @transform_2(%arg0: i32) -> (i32, i32) {
    %c0_i32 = arith.constant 0 : i32
    %c0_i32_0 = arith.constant 0 : i32
    %c0_i32_1 = arith.constant 0 : i32
    return %c0_i32, %c0_i32_0 : i32, i32
  }
  func.func @transform_3(%arg0: i32) -> (i32, i32) {
    %c0_i32 = arith.constant 0 : i32
    %c0_i32_0 = arith.constant 0 : i32
    %c0_i32_1 = arith.constant 0 : i32
    return %c0_i32, %c0_i32_0 : i32, i32
  }
  func.func @transform_4(%arg0: i32) -> (i32, i32) {
    %c0_i32 = arith.constant 0 : i32
    %c0_i32_0 = arith.constant 0 : i32
    %c0_i32_1 = arith.constant 0 : i32
    return %c0_i32, %c0_i32_0 : i32, i32
  }
  func.func @transform_5(%arg0: i32) -> (i32, i32) {
    %c0_i32 = arith.constant 0 : i32
    %c0_i32_0 = arith.constant 0 : i32
    %c0_i32_1 = arith.constant 0 : i32
    return %c0_i32, %c0_i32_0 : i32, i32
  }
  func.func @transform_6(%arg0: i32) -> (i32, i32) {
    %c0_i32 = arith.constant 0 : i32
    %c0_i32_0 = arith.constant 0 : i32
    %c0_i32_1 = arith.constant 0 : i32
    return %c0_i32, %c0_i32_0 : i32, i32
  }
  func.func @transform_7(%arg0: i32) -> (i32, i32) {
    %c0_i32 = arith.constant 0 : i32
    %c0_i32_0 = arith.constant 0 : i32
    %c0_i32_1 = arith.constant 0 : i32
    return %c0_i32, %c0_i32_0 : i32, i32
  }
  func.func @transform_8(%arg0: i32) -> (i32, i32) {
    %c0_i32 = arith.constant 0 : i32
    %c0_i32_0 = arith.constant 0 : i32
    %c0_i32_1 = arith.constant 0 : i32
    return %c0_i32, %c0_i32_0 : i32, i32
  }
  func.func @transform_9(%arg0: i32) -> (i32, i32) {
    %c0_i32 = arith.constant 0 : i32
    %c0_i32_0 = arith.constant 0 : i32
    return %arg0, %c0_i32 : i32, i32
  }
}

</mosaic_0001>

<bundles_post_ra>
// kernel: tpu_custom_call.1
= control target key start
LH: loop header
LB: loop body
LE: loop exit
PB: predicated region body
PF: predicated region fallthrough
CT: control target
= control target key end

     0   :  { %14 = vsyncpa [#allocation3], 0  ;;  %s760_s0 = inlined_call_operand.hbm [shape: f32[8,16], index: 0, kind: input, shape index: {}]   ;;  %s761_s1 = inlined_call_operand.hbm [shape: f32[8,8], index: 1, kind: input, shape index: {}]   ;;  %s762_s2 = inlined_call_operand.vmem [shape: f32[16,64], index: 2, kind: input, shape index: {}]   ;;  %s763_s3 = inlined_call_operand.hbm [shape: f32[8,64], index: 3, kind: input, shape index: {}]   ;;  %s764_s4 = inlined_call_operand.vmem [shape: f32[1,64], index: 4, kind: input, shape index: {}]   ;;  %s765_s5 = inlined_call_operand.vmem [shape: f32[64,64], index: 5, kind: input, shape index: {}]   ;;  %s766_s6 = inlined_call_operand.vmem [shape: f32[1,64], index: 6, kind: input, shape index: {}]   ;;  %s767_s7 = inlined_call_operand.vmem [shape: f32[64,2], index: 7, kind: input, shape index: {}]   ;;  %s768_s8 = inlined_call_operand.vmem [shape: f32[1,2], index: 8, kind: input, shape index: {}]   ;;  %s769_s9 = inlined_call_operand.vmem [shape: f32[8,2], index: 9, kind: output, shape index: {}]  }
   0x1   :  { %15 = vsyncpa [#allocation5], 0  ;;  %s598_s30 = smov [#allocation4]   ;;  %s599_s11 = smov [#allocation2]  }
   0x2   :  { %s32_s10 = sshll.u32 %s598_s30, 4  ;;  %s22_s12 = sshll.u32 %s599_s11, 4  ;;  %s33_s10 = int_to_ptr.vmem [resolvable:$true] %s32_s10  ;;  %s23_s12 = int_to_ptr.vmem [resolvable:$true] %s22_s12 }
   0x3   :  { %s528_s15 = scalar_lea.hbm %s761_s1, 128 }
   0x4   :  { %p529_p0 = scmp.ne.s32.totalorder %s761_s1, %s528_s15  ;;  %p532_p1 = scmp.lt.u32.totalorder %s528_s15, %s761_s1 }
   0x6   :  { %p534_p2 = pnand %p532_p1, %p529_p0 }
   0x8   :  { %537 = shalt.err (!%p534_p2)
}
   0x9   :  { %s538_s20 = scalar_lea.vmem %s33_s10, 128  ;;  %p543_p4 = scmp.lt.s32.totalorder %s33_s10, %s33_s10 }
   0xa   :  { %p539_p3 = scmp.ne.s32.totalorder %s33_s10, %s538_s20  ;;  %p544_p5 = scmp.lt.s32.totalorder %s538_s20, %s538_s20 }
   0xc   :  { %p545_p6 = por %p544_p5, %p543_p4 }
   0xe   :  { %p546_p7 = pnand %p545_p6, %p539_p3 }
  0x10   :  { %549 = shalt.err (!%p546_p7)
}
  0x11   :  { %35 = dma.hbm_to_vmem [thread:$0]  %s761_s1, 128, %s33_s10, [#allocation5]  }
  0x12   :  { %s550_s25 = scalar_lea.hbm %s760_s0, 128 }
  0x13   :  { %p551_p8 = scmp.ne.s32.totalorder %s760_s0, %s550_s25  ;;  %p554_p9 = scmp.lt.u32.totalorder %s550_s25, %s760_s0 }
  0x15   :  { %p556_p10 = pnand %p554_p9, %p551_p8 }
  0x17   :  { %559 = shalt.err (!%p556_p10)
}
  0x18   :  { %s560_s30 = scalar_lea.vmem %s23_s12, 128  ;;  %p565_p12 = scmp.lt.s32.totalorder %s23_s12, %s23_s12 }
  0x19   :  { %p561_p11 = scmp.ne.s32.totalorder %s23_s12, %s560_s30  ;;  %p566_p13 = scmp.lt.s32.totalorder %s560_s30, %s560_s30 }
  0x1b   :  { %p567_p0 = por %p566_p13, %p565_p12 }
  0x1d   :  { %p568_p1 = pnand %p567_p0, %p561_p11 }
  0x1f   :  { %571 = shalt.err (!%p568_p1)
}
  0x20   :  { %25 = dma.hbm_to_vmem [thread:$0]  %s760_s0, 128, %s23_s12, [#allocation3]  }
  0x21   :  { %s600_s11 = smov [#allocation6]   ;;  %s572_s16 = scalar_lea.hbm %s763_s3, 128 }
  0x22   :  { %s44_s13 = sshll.u32 %s600_s11, 4  ;;  %p573_p2 = scmp.ne.s32.totalorder %s763_s3, %s572_s16  ;;  %s45_s13 = int_to_ptr.vmem [resolvable:$true] %s44_s13 }
  0x23   :  { %p576_p3 = scmp.lt.u32.totalorder %s572_s16, %s763_s3 }
  0x25   :  { %p578_p4 = pnand %p576_p3, %p573_p2 }
  0x27   :  { %581 = shalt.err (!%p578_p4)
}
  0x28   :  { %s582_s21 = scalar_lea.vmem %s45_s13, 128  ;;  %p587_p6 = scmp.lt.s32.totalorder %s45_s13, %s45_s13 }
  0x29   :  { %p583_p5 = scmp.ne.s32.totalorder %s45_s13, %s582_s21  ;;  %p588_p7 = scmp.lt.s32.totalorder %s582_s21, %s582_s21 }
  0x2b   :  { %p589_p8 = por %p588_p7, %p587_p6 }
  0x2d   :  { %p590_p9 = pnand %p589_p8, %p583_p5 }
  0x2f   :  { %593 = shalt.err (!%p590_p9)
}
  0x30   :  { %47 = dma.hbm_to_vmem [thread:$0]  %s763_s3, 128, %s45_s13, [#allocation5]  }
  0x31   :  { %594 = dma.done.wait [#allocation3], 128  }
  0x32   :  { %595 = vsyncadd [#allocation3], 4294967168 }
  0x33   :  { %596 = dma.done.wait [#allocation5], 256  }
  0x34   :  { %597 = vsyncadd [#allocation5], 4294967040  ;;  %v601_v0 = vmov 0.0|0.0   ;;  %v602_v1 = vmov 0.0   ;;  %vm603_vm0 = vmmov 0   ;;  %vm72_vm1 = vcmask 64512  }
  0x35   :  { %495 = vmatprep.subr.bf16.mxu1 %v601_v0  ;;  %445 = vmatprep.subr.mxu0 %v602_v1  ;;  %v68_v2 = vld [vmem:[%s762_s2] sm:$0xff]  ;;  %v69_v3 = vld [vmem:[%s762_s2 + $0x8] sm:$0xff]  ;;  %v71_v4 = vld [vmem:[#allocation6] sm:$0xff]  ;;  %vm146_vm2 = vcmask 130048   ;;  %vm244_vm3 = vcmask 523264   ;;  %vm407_vm4 = vcmask 15360  }
  0x36   :  { %447 = vmatprep.mubr.msk.f32.mxu0 %vm603_vm0, %v602_v1  ;;  %454 = vmatprep.mubr.msk.f32.mxu1 %vm603_vm0, %v602_v1  ;;  %v496_v5 = vpack.c.bf16 %v69_v3, %v68_v2  ;;  %v70_v6 = vld [vmem:[#allocation4] sm:$0xff]  ;;  %v229_v7 = vld [vmem:[%s765_s5] sm:$0xff]  ;;  %v231_v9 = vld [vmem:[%s765_s5 + $0x10] sm:$0xff] }
  0x37   :  { %446 = vmatpush3.msra.mxu0 %v71_v4  ;;  %v230_v8 = vld [vmem:[%s765_s5 + $0x8] sm:$0xff]  ;;  %v232_v10 = vld [vmem:[%s765_s5 + $0x18] sm:$0xff]  ;;  %v67_v11 = vld [vmem:[#allocation2] sm:$0xff] }
  0x38   :  { %448 = vmatmul.mubr.msk.f32.vlgmr.msra.gmra.mrb[0].mxu0 %vm72_vm1, %v70_v6  ;;  %498 = vmatprep.subr.bf16.mxu0 %v601_v0  ;;  %v499_v12 = vpack.c.bf16 %v230_v8, %v229_v7  ;;  %v502_v13 = vpack.c.bf16 %v232_v10, %v231_v9  ;;  %v233_v14 = vld [vmem:[%s765_s5 + $0x20] sm:$0xff]  ;;  %v234_v15 = vld [vmem:[%s765_s5 + $0x28] sm:$0xff]  ;;  %v235_v17 = vld [vmem:[%s765_s5 + $0x30] sm:$0xff] }
  0x39   :  { %497 = vmatpush3.bf16.msra.mxu1 %v496_v5  ;;  %473 = vmatprep.mubr.msk.f32.mxu0 %vm603_vm0, %v602_v1  ;;  %v505_v16 = vpack.c.bf16 %v234_v15, %v233_v14  ;;  %v236_v18 = vld [vmem:[%s765_s5 + $0x38] sm:$0xff]  ;;  %v319_v20 = vld [vmem:[%s767_s7] sm:$0xff]  ;;  %v320_v21 = vld [vmem:[%s767_s7 + $0x8] sm:$0xff] }
  0x3a   :  { %510 = vmatprep.subr.bf16.mxu1 %v601_v0  ;;  %500 = vmatpush3.bf16.msra.mxu0 %v499_v12  ;;  %v508_v19 = vpack.c.bf16 %v236_v18, %v235_v17  ;;  %v321_v22 = vld [vmem:[%s767_s7 + $0x10] sm:$0xff]  ;;  %v511_v23 = vpack.c.bf16 %v320_v21, %v319_v20  ;;  %v322_v24 = vld [vmem:[%s767_s7 + $0x18] sm:$0xff]  ;;  %v323_v26 = vld [vmem:[%s767_s7 + $0x20] sm:$0xff] }
  0x3b   :  { %501 = vmatprep.subr.bf16.mxu0 %v601_v0  ;;  %v514_v25 = vpack.c.bf16 %v322_v24, %v321_v22  ;;  %v324_v27 = vld [vmem:[%s767_s7 + $0x28] sm:$0xff]  ;;  %v417_v32 = vld [vmem:[%s764_s4] ss:$0 sm:$0xff]  ;;  %v325_v37 = vld [vmem:[%s767_s7 + $0x30] sm:$0xff] }
  0x3c   :  { %455 = vmatmul.mubr.msk.f32.vlgmr.msra.gmra.mrb[0].mxu1 %vm146_vm2, %v67_v11  ;;  %v517_v28 = vpack.c.bf16 %v324_v27, %v323_v26  ;;  %v326_v38 = vld [vmem:[%s767_s7 + $0x38] sm:$0xff]  ;;  %v418_v40 = vld [vmem:[%s766_s6] ss:$0 sm:$0xff] }
  0x3d   :  { %492 = vmatprep.mubr.msk.f32.mxu1 %vm603_vm0, %v602_v1  ;;  %512 = vmatpush3.bf16.msra.mxu1 %v511_v23  ;;  %v520_v39 = vpack.c.bf16 %v326_v38, %v325_v37  ;;  %v420_v45 = vld [vmem:[%s768_s8] ss:$0 sm:$0xff] }
  0x3e   :  { %503 = vmatpush3.bf16.msra.mxu0 %v502_v13  ;;  %513 = vmatprep.subr.bf16.mxu1 %v601_v0 }
  0x3f   :  { %504 = vmatprep.subr.bf16.mxu0 %v601_v0 }
  0x41   :  { %515 = vmatpush3.bf16.msra.mxu1 %v514_v25 }
  0x42   :  { %506 = vmatpush3.bf16.msra.mxu0 %v505_v16  ;;  %516 = vmatprep.subr.bf16.mxu1 %v601_v0 }
  0x43   :  { %507 = vmatprep.subr.bf16.mxu0 %v601_v0 }
  0x45   :  { %518 = vmatpush3.bf16.msra.mxu1 %v517_v28 }
  0x46   :  { %509 = vmatpush3.bf16.msra.mxu0 %v508_v19  ;;  %519 = vmatprep.subr.bf16.mxu1 %v601_v0 }
  0x49   :  { %521 = vmatpush3.bf16.msra.mxu1 %v520_v39 }
 0x10b   :  { %v142_v29 = vpop.f32.mrb[0].mxu0 }
 0x10c   :  { %v449_v30 = vpop.f32.mrb[1].mxu0 }
 0x10f   :  { %v216_v31 = vpop.f32.mrb[0].mxu1 }
 0x110   :  { %v217_v33 = vadd.f32 %v216_v31, %v142_v29  ;;  %v456_v34 = vpop.f32.mrb[1].mxu1 }
 0x112   :  { %v227_v35 = vadd.f32 %v417_v32, %v217_v33 }
 0x114   :  { %v228_v36 = vmax.f32 %v227_v35, 0.0 }
 0x116   :  { %474 = vmatmul.mubr.msk.f32.vlgmr.msra.gmra.mrb[2].mxu0 %vm244_vm3, %v228_v36 }
 0x1e9   :  { %v314_v41 = vpop.f32.mrb[2].mxu0 }
 0x1ea   :  { %v315_v42 = vadd.f32 %v418_v40, %v314_v41  ;;  %v475_v43 = vpop.f32.mrb[3].mxu0 }
 0x1ec   :  { %v318_v44 = vmax.f32 %v315_v42, 0.0 }
 0x1ee   :  { %493 = vmatmul.mubr.msk.f32.vlgmr.msra.gmra.mrb[2].mxu1 %vm244_vm3, %v318_v44 }
 0x2c1   :  { %v403_v46 = vpop.f32.mrb[2].mxu1 }
 0x2c2   :  { %v404_v47 = vadd.f32 %v420_v45, %v403_v46  ;;  %v494_v48 = vpop.f32.mrb[3].mxu1 }
 0x2c4   :  { %408 = vst.msk [vmem:[%s769_s9] sm:$0xff] %vm407_vm4, %v404_v47 }
 0x2c5   :  { %413 = vsyncpa [#allocation3], 1 }
 0x2c6   :  { %414 = vsyncpa [#allocation5], 1 }

</bundles_post_ra>
